<compile_context>
chip_gen: v5e
topology: v5e:2x2
jax: 0.10.0
libtpu: 0.0.40
codegen_flags: <defaults>
</compile_context>

<pallas_src>
import math

import jax
import jax.numpy as jnp
from jax.experimental import pallas as pl
from jax.experimental.pallas import tpu as pltpu


def _round_up(x, m):
    return ((x + m - 1) // m) * m


def _gcn_dist_kernel(a_ref, h_ref, w_ref, b_ref, o_ref, acc_ref):
    k = pl.program_id(1)

    @pl.when(k == 0)
    def _zero():
        acc_ref[...] = jnp.zeros_like(acc_ref)

    # Message passing + neighbour-sum over this K tile:
    #   acc[v, :] += sum_u A[v, u] * H[u, :]     (bf16 MXU, f32 accumulate)
    acc_ref[...] += jnp.dot(
        a_ref[...], h_ref[...], preferred_element_type=jnp.float32
    )

    # Finalize once the reduction over neighbours is complete: project + bias.
    @pl.when(k == pl.num_programs(1) - 1)
    def _finalize():
        out = jnp.dot(
            acc_ref[...], w_ref[...], preferred_element_type=jnp.float32
        )
        o_ref[...] = (out + b_ref[...]).astype(o_ref.dtype)


def gcn_dist_forward(adj, h, weight, bias, *, tm=256, tk=512):
    """adj: [N, N], h: [N, F_in], weight: [F_in, F_out], bias: [F_out]."""
    n, f_in = h.shape
    f_out = weight.shape[1]

    # Lane-dense feature dims (multiples of 128); tile-aligned node dims.
    f_in_p = _round_up(max(f_in, 128), 128)
    f_out_p = _round_up(max(f_out, 128), 128)
    tm = min(tm, _round_up(n, 8))      # sublane dim of A/out tiles
    tk = min(tk, _round_up(n, 128))    # lane dim of A tile / sublane of H tile
    n_rows = _round_up(n, tm)
    n_cols = _round_up(n, tk)

    # bf16 for the bandwidth-dominant A/H streams; W/bias stay f32.
    adj_p = jnp.zeros((n_rows, n_cols), jnp.bfloat16).at[:n, :n].set(
        adj.astype(jnp.bfloat16))
    h_p = jnp.zeros((n_cols, f_in_p), jnp.bfloat16).at[:n, :f_in].set(
        h.astype(jnp.bfloat16))
    w_p = jnp.zeros((f_in_p, f_out_p), jnp.float32).at[:f_in, :f_out].set(
        weight.astype(jnp.float32))
    b_p = jnp.zeros((1, f_out_p), jnp.float32).at[0, :f_out].set(
        bias.astype(jnp.float32))

    grid = (n_rows // tm, n_cols // tk)

    out_p = pl.pallas_call(
        _gcn_dist_kernel,
        out_shape=jax.ShapeDtypeStruct((n_rows, f_out_p), jnp.float32),
        grid_spec=pltpu.PrefetchScalarGridSpec(
            num_scalar_prefetch=0,
            grid=grid,
            in_specs=[
                pl.BlockSpec((tm, tk), lambda i, k: (i, k)),           # A tile
                pl.BlockSpec((tk, f_in_p), lambda i, k: (k, 0)),       # H tile
                pl.BlockSpec((f_in_p, f_out_p), lambda i, k: (0, 0)),  # W (resident)
                pl.BlockSpec((1, f_out_p), lambda i, k: (0, 0)),       # bias (resident)
            ],
            out_specs=pl.BlockSpec((tm, f_out_p), lambda i, k: (i, 0)),
            scratch_shapes=[pltpu.VMEM((tm, f_in_p), jnp.float32)],
        ),
        compiler_params=pltpu.CompilerParams(
            dimension_semantics=("parallel", "arbitrary"),
            vmem_limit_bytes=32 * 1024 * 1024,
        ),
    )(adj_p, h_p, w_p, b_p)

    return out_p[:n, :f_out]


def make_params(key, in_features, out_features):
    """Deterministic init matching GraphConvolution.reset_parameters()."""
    stdv = 1.0 / math.sqrt(out_features)
    kw, kb = jax.random.split(key)
    weight = jax.random.uniform(
        kw, (in_features, out_features), jnp.float32, -stdv, stdv
    )
    bias = jax.random.uniform(kb, (out_features,), jnp.float32, -stdv, stdv)
    return weight, bias


if __name__ == "__main__":
    key = jax.random.PRNGKey(0)
    k_adj, k_h, k_params = jax.random.split(key, 3)

    N = 16          # number of graph nodes
    F_IN = 32       # in_features
    F_OUT = 32      # out_features

    # Node features 'h'
    h = jax.random.normal(k_h, (N, F_IN), dtype=jnp.float32)

    # Edge distances 'd' as dense weighted adjacency A[v, u] = d_{u->v}
    k_mask, k_dist = jax.random.split(k_adj)
    mask = (jax.random.uniform(k_mask, (N, N)) > 0.5).astype(jnp.float32)
    dist = jax.random.uniform(k_dist, (N, N), jnp.float32, 0.1, 2.0)
    adj = mask * dist

    weight, bias = make_params(k_params, F_IN, F_OUT)

    out = gcn_dist_forward(adj, h, weight, bias)
    out = jax.block_until_ready(out)

    # Pure-JAX reference (same bf16 rounding of the A/H streams, f32 accumulate).
    a32 = adj.astype(jnp.bfloat16).astype(jnp.float32)
    h32 = h.astype(jnp.bfloat16).astype(jnp.float32)
    ref = (a32 @ h32) @ weight + bias

    assert out.shape == (N, F_OUT)
    assert jnp.allclose(out, ref, atol=1e-2, rtol=1e-2), "mismatch vs reference"

    print("KERNEL_OK")
</pallas_src>

<mosaic_0001>
module attributes {stable_mosaic.version = 11 : i64} {
  func.func @_gcn_dist_kernel(%arg0: i32, %arg1: i32, %arg2: memref<16x128xbf16, #tpu.memory_space<vmem>>, %arg3: memref<128x128xbf16, #tpu.memory_space<vmem>>, %arg4: memref<128x128xf32, #tpu.memory_space<vmem>>, %arg5: memref<1x128xf32, #tpu.memory_space<vmem>>, %arg6: memref<16x128xf32, #tpu.memory_space<vmem>>, %arg7: memref<16x128xf32, #tpu.memory_space<vmem>>) attributes {dimension_semantics = [#tpu.dimension_semantics<parallel>, #tpu.dimension_semantics<arbitrary>], iteration_bounds = array<i64: 1, 1>, scalar_prefetch = 0 : i64, scratch_operands = 1 : i64, tpu.core_type = #tpu.core_type<tc>, window_params = [{transform_indices = @transform_0, window_bounds = array<i64: 16, 128>}, {transform_indices = @transform_1, window_bounds = array<i64: 128, 128>}, {pipeline_mode = #tpu.pipeline_mode<synchronous>, transform_indices = @transform_2, window_bounds = array<i64: 128, 128>}, {pipeline_mode = #tpu.pipeline_mode<synchronous>, transform_indices = @transform_3, window_bounds = array<i64: 1, 128>}, {transform_indices = @transform_4, window_bounds = array<i64: 16, 128>}]} {
    %c0_i32 = arith.constant 0 : i32
    %0 = arith.cmpi eq, %arg1, %c0_i32 : i32
    %1 = arith.extui %0 : i1 to i32
    %c0_i32_0 = arith.constant 0 : i32
    %2 = arith.cmpi ne, %1, %c0_i32_0 : i32
    scf.if %2 {
      %cst_10 = arith.constant 0.000000e+00 : f32
      %12 = vector.broadcast %cst_10 : f32 to vector<16x128xf32>
      %c0_11 = arith.constant 0 : index
      %c0_12 = arith.constant 0 : index
      %13 = vector.load %arg7[%c0_11, %c0_12] : memref<16x128xf32, #tpu.memory_space<vmem>>, vector<16x128xf32>
      tpu.vector_store %arg7[%c0_11, %c0_12], %12 {strides = array<i32>} : memref<16x128xf32, #tpu.memory_space<vmem>>, vector<16x128xf32>,
    } else {
    }
    %c0 = arith.constant 0 : index
    %c0_1 = arith.constant 0 : index
    %3 = vector.load %arg7[%c0, %c0_1] : memref<16x128xf32, #tpu.memory_space<vmem>>, vector<16x128xf32>
    %c0_2 = arith.constant 0 : index
    %c0_3 = arith.constant 0 : index
    %4 = vector.load %arg2[%c0_2, %c0_3] : memref<16x128xbf16, #tpu.memory_space<vmem>>, vector<16x128xbf16>
    %c0_4 = arith.constant 0 : index
    %c0_5 = arith.constant 0 : index
    %5 = vector.load %arg3[%c0_4, %c0_5] : memref<128x128xbf16, #tpu.memory_space<vmem>>, vector<128x128xbf16>
    %cst = arith.constant dense<0.000000e+00> : vector<16x128xf32>
    %6 = tpu.matmul %4, %5, %cst {dimension_numbers = #tpu.dot_dimension_numbers<[1], [0], [0], [1], [0, 0, 1, 1], [], []>} : vector<16x128xbf16>, vector<128x128xbf16>, vector<16x128xf32> -> vector<16x128xf32>
    %7 = arith.addf %3, %6 : vector<16x128xf32>
    %c0_6 = arith.constant 0 : index
    %c0_7 = arith.constant 0 : index
    %8 = vector.load %arg7[%c0_6, %c0_7] : memref<16x128xf32, #tpu.memory_space<vmem>>, vector<16x128xf32>
    tpu.vector_store %arg7[%c0_6, %c0_7], %7 {strides = array<i32>} : memref<16x128xf32, #tpu.memory_space<vmem>>, vector<16x128xf32>,
    %c0_i32_8 = arith.constant 0 : i32
    %9 = arith.cmpi eq, %arg1, %c0_i32_8 : i32
    %10 = arith.extui %9 : i1 to i32
    %c0_i32_9 = arith.constant 0 : i32
    %11 = arith.cmpi ne, %10, %c0_i32_9 : i32
    scf.if %11 {
      %c0_10 = arith.constant 0 : index
      %c0_11 = arith.constant 0 : index
      %12 = vector.load %arg7[%c0_10, %c0_11] : memref<16x128xf32, #tpu.memory_space<vmem>>, vector<16x128xf32>
      %c0_12 = arith.constant 0 : index
      %c0_13 = arith.constant 0 : index
      %13 = vector.load %arg4[%c0_12, %c0_13] : memref<128x128xf32, #tpu.memory_space<vmem>>, vector<128x128xf32>
      %cst_14 = arith.constant dense<0.000000e+00> : vector<16x128xf32>
      %14 = tpu.matmul %12, %13, %cst_14 {dimension_numbers = #tpu.dot_dimension_numbers<[1], [0], [0], [1], [0, 0, 1, 1], [], []>} : vector<16x128xf32>, vector<128x128xf32>, vector<16x128xf32> -> vector<16x128xf32>
      %c0_15 = arith.constant 0 : index
      %c0_16 = arith.constant 0 : index
      %15 = vector.load %arg5[%c0_15, %c0_16] : memref<1x128xf32, #tpu.memory_space<vmem>>, vector<1x128xf32>
      %16 = vector.broadcast %15 : vector<1x128xf32> to vector<16x128xf32>
      %17 = arith.addf %14, %16 : vector<16x128xf32>
      %c0_17 = arith.constant 0 : index
      %c0_18 = arith.constant 0 : index
      %18 = vector.load %arg6[%c0_17, %c0_18] : memref<16x128xf32, #tpu.memory_space<vmem>>, vector<16x128xf32>
      tpu.vector_store %arg6[%c0_17, %c0_18], %17 {strides = array<i32>} : memref<16x128xf32, #tpu.memory_space<vmem>>, vector<16x128xf32>,
    } else {
    }
    return
  }
  func.func @transform_0(%arg0: i32, %arg1: i32) -> (i32, i32) {
    %c0_i32 = arith.constant 0 : i32
    return %arg0, %arg1 : i32, i32
  }
  func.func @transform_1(%arg0: i32, %arg1: i32) -> (i32, i32) {
    %c0_i32 = arith.constant 0 : i32
    %c0_i32_0 = arith.constant 0 : i32
    return %arg1, %c0_i32 : i32, i32
  }
  func.func @transform_2(%arg0: i32, %arg1: i32) -> (i32, i32) {
    %c0_i32 = arith.constant 0 : i32
    %c0_i32_0 = arith.constant 0 : i32
    %c0_i32_1 = arith.constant 0 : i32
    return %c0_i32, %c0_i32_0 : i32, i32
  }
  func.func @transform_3(%arg0: i32, %arg1: i32) -> (i32, i32) {
    %c0_i32 = arith.constant 0 : i32
    %c0_i32_0 = arith.constant 0 : i32
    %c0_i32_1 = arith.constant 0 : i32
    return %c0_i32, %c0_i32_0 : i32, i32
  }
  func.func @transform_4(%arg0: i32, %arg1: i32) -> (i32, i32) {
    %c0_i32 = arith.constant 0 : i32
    %c0_i32_0 = arith.constant 0 : i32
    return %arg0, %c0_i32 : i32, i32
  }
}

</mosaic_0001>

<bundles_post_ra>
// kernel: tpu_custom_call.1
= control target key start
LH: loop header
LB: loop body
LE: loop exit
PB: predicated region body
PF: predicated region fallthrough
CT: control target
= control target key end

     0   :  { %9 = vsyncpa [#allocation4], 0  ;;  %s443_s0 = inlined_call_operand.hbm [shape: bf16[16,128], index: 0, kind: input, shape index: {}]   ;;  %s444_s1 = inlined_call_operand.hbm [shape: bf16[128,128], index: 1, kind: input, shape index: {}]   ;;  %s445_s2 = inlined_call_operand.hbm [shape: f32[128,128], index: 2, kind: input, shape index: {}]   ;;  %s446_s3 = inlined_call_operand.vmem [shape: f32[1,128], index: 3, kind: input, shape index: {}]   ;;  %s447_s4 = inlined_call_operand.hbm [shape: f32[16,128], index: 4, kind: output, shape index: {}]  }
   0x1   :  { %10 = vsyncpa [#allocation7], 0 }
   0x2   :  { %11 = vsyncpa [#allocation5], 0  ;;  %s29_s17 = sshll.u32 %s444_s1, 4  ;;  %s389_s18 = smov [#allocation6]   ;;  %s30_s17 = int_to_ptr.hbm [resolvable:$true] %s29_s17 }
   0x3   :  { %s31_s19 = sshll.u32 %s389_s18, 4  ;;  %s16_s22 = sshll.u32 %s443_s0, 4  ;;  %s32_s19 = int_to_ptr.vmem [resolvable:$true] %s31_s19  ;;  %s17_s22 = int_to_ptr.hbm [resolvable:$true] %s16_s22 }
   0x4   :  { %s390_s23 = smov 64   ;;  %s391_s24 = smov 4  }
   0x5   :  { %37 = dma.hbm_to_vmem [thread:$0]  %s30_s17, 1024, %s32_s19, [#allocation7], %s390_s23, %s390_s23, %s391_s24  }
   0x6   :  { %s392_s25 = smov [#allocation3]   ;;  %s42_s29 = sshll.u32 %s445_s2, 4  ;;  %s43_s29 = int_to_ptr.hbm [resolvable:$true] %s42_s29 }
   0x7   :  { %s18_s26 = sshll.u32 %s392_s25, 4  ;;  %s393_s1 = smov [#allocation8]   ;;  %s19_s26 = int_to_ptr.vmem [resolvable:$true] %s18_s26 }
   0x8   :  { %24 = dma.hbm_to_vmem [thread:$0]  %s17_s22, 128, %s19_s26, [#allocation4], %s390_s23, %s390_s23, %s391_s24  }
   0x9   :  { %s44_s30 = sshll.u32 %s393_s1, 4  ;;  %s394_s5 = smov 128   ;;  %s45_s30 = int_to_ptr.vmem [resolvable:$true] %s44_s30 }
   0xa   :  { %s395_s6 = smov 8  }
   0xb   :  { %50 = dma.hbm_to_vmem [thread:$0]  %s43_s29, 2048, %s45_s30, [#allocation7], %s394_s5, %s394_s5, %s395_s6  }
   0xc   :  { %383 = dma.done.wait [#allocation4], 128  }
   0xd   :  { %384 = vsyncadd [#allocation4], 4294967168 }
   0xe   :  { %385 = dma.done.wait [#allocation7], 3072  }
   0xf   :  { %386 = vsyncadd [#allocation7], 4294964224  ;;  %v277_v0 = vld [vmem:[#allocation6 + $0x38] sm:$0xff]  ;;  %v276_v1 = vld [vmem:[#allocation6 + $0x30] sm:$0xff]  ;;  %s396_s7 = smov [#allocation9]   ;;  %s219_s11 = sshll.u32 %s447_s4, 4  ;;  %s220_s11 = int_to_ptr.hbm [resolvable:$true] %s219_s11 }
  0x10   :  { %145 = vmatpush.bf16.msra.mxu0 %v277_v0  ;;  %v183_v2 = vld [vmem:[#allocation8 + $0x78] sm:$0xff]  ;;  %v182_v3 = vld [vmem:[#allocation8 + $0x70] sm:$0xff]  ;;  %v181_v4 = vld [vmem:[#allocation8 + $0x68] sm:$0xff]  ;;  %s217_s8 = sshll.u32 %s396_s7, 4  ;;  %s218_s8 = int_to_ptr.vmem [resolvable:$true] %s217_s8 }
  0x11   :  { %188 = vmatpush.msra.mxu1 %v183_v2  ;;  %v275_v5 = vld [vmem:[#allocation6 + $0x28] sm:$0xff]  ;;  %v180_v6 = vld [vmem:[#allocation8 + $0x60] sm:$0xff]  ;;  %v179_v7 = vld [vmem:[#allocation8 + $0x58] sm:$0xff] }
  0x12   :  { %v274_v8 = vld [vmem:[#allocation6 + $0x20] sm:$0xff]  ;;  %v178_v9 = vld [vmem:[#allocation8 + $0x50] sm:$0xff]  ;;  %v177_v10 = vld [vmem:[#allocation8 + $0x48] sm:$0xff] }
  0x13   :  { %189 = vmatpush.msra.mxu1 %v182_v3  ;;  %v273_v11 = vld [vmem:[#allocation6 + $0x18] sm:$0xff]  ;;  %v176_v12 = vld [vmem:[#allocation8 + $0x40] sm:$0xff]  ;;  %v272_v14 = vld [vmem:[#allocation6 + $0x10] sm:$0xff] }
  0x14   :  { %146 = vmatpush.bf16.msra.mxu0 %v276_v1  ;;  %v175_v13 = vld [vmem:[#allocation8 + $0x38] sm:$0xff]  ;;  %v174_v15 = vld [vmem:[#allocation8 + $0x30] sm:$0xff]  ;;  %v173_v16 = vld [vmem:[#allocation8 + $0x28] sm:$0xff] }
  0x15   :  { %190 = vmatpush.msra.mxu1 %v181_v4  ;;  %v271_v17 = vld [vmem:[#allocation6 + $0x8] sm:$0xff]  ;;  %v172_v18 = vld [vmem:[#allocation8 + $0x20] sm:$0xff]  ;;  %v171_v19 = vld [vmem:[#allocation8 + $0x18] sm:$0xff] }
  0x16   :  { %v270_v20 = vld [vmem:[#allocation6] sm:$0xff]  ;;  %v170_v21 = vld [vmem:[#allocation8 + $0x10] sm:$0xff]  ;;  %v269_v22 = vld [vmem:[#allocation3] sm:$0xff] }
  0x17   :  { %191 = vmatpush.msra.mxu1 %v180_v6  ;;  %v169_v23 = vld [vmem:[#allocation8 + $0x8] sm:$0xff]  ;;  %v168_v24 = vld [vmem:[#allocation8] sm:$0xff]  ;;  %v286_v27 = vld [vmem:[%s446_s3] ss:$0 sm:$0xff] }
  0x18   :  { %147 = vmatpush.bf16.msra.mxu0 %v275_v5 }
  0x19   :  { %192 = vmatpush.msra.mxu1 %v179_v7 }
  0x1b   :  { %193 = vmatpush.msra.mxu1 %v178_v9 }
  0x1c   :  { %148 = vmatpush.bf16.msra.mxu0 %v274_v8 }
  0x1d   :  { %194 = vmatpush.msra.mxu1 %v177_v10 }
  0x1f   :  { %195 = vmatpush.msra.mxu1 %v176_v12 }
  0x20   :  { %149 = vmatpush.bf16.msra.mxu0 %v273_v11 }
  0x21   :  { %196 = vmatpush.msra.mxu1 %v175_v13 }
  0x23   :  { %197 = vmatpush.msra.mxu1 %v174_v15 }
  0x24   :  { %150 = vmatpush.bf16.msra.mxu0 %v272_v14 }
  0x25   :  { %198 = vmatpush.msra.mxu1 %v173_v16 }
  0x27   :  { %199 = vmatpush.msra.mxu1 %v172_v18 }
  0x28   :  { %151 = vmatpush.bf16.msra.mxu0 %v271_v17 }
  0x29   :  { %200 = vmatpush.msra.mxu1 %v171_v19 }
  0x2b   :  { %201 = vmatpush.msra.mxu1 %v170_v21 }
  0x2c   :  { %152 = vmatpush.bf16.msra.mxu0 %v270_v20 }
  0x2d   :  { %202 = vmatpush.msra.mxu1 %v169_v23 }
  0x2f   :  { %153 = vmatmul.bf16.vlgmr.msra.gmra.mxu0 %v269_v22  ;;  %203 = vmatpush.msra.mxu1 %v168_v24 }
  0xac   :  { %v154_v25 = vpop.f32.mrf.mxu0 }
  0xad   :  { %204 = vmatmul.f32.vlgmr.msra.gmra.mxu1 %v154_v25 }
  0xb4   :  { %v156_v26 = vpop.f32.mrf.mxu0 }
  0xb5   :  { %207 = vmatmul.f32.gmra.mxu1 %v156_v26 }
 0x12a   :  { %v205_v28 = vpop.f32.mrf.mxu1 }
 0x12b   :  { %v206_v29 = vadd.f32 %v286_v27, %v205_v28 }
 0x12d   :  { %211 = vst [vmem:[#allocation9] sm:$0xff] %v206_v29 }
 0x132   :  { %v208_v30 = vpop.f32.mrf.mxu1 }
 0x133   :  { %v209_v31 = vadd.f32 %v286_v27, %v208_v30 }
 0x135   :  { %212 = vst [vmem:[#allocation9 + $0x8] sm:$0xff] %v209_v31 }
 0x136   :  { %225 = dma.vmem_to_hbm [thread:$0]  %s218_s8, 256, %s220_s11, [#allocation5], %s394_s5, %s394_s5, %s395_s6  }
 0x137   :  { %387 = dma.done.wait [#allocation5], 256  }
 0x138   :  { %388 = vsyncadd [#allocation5], 4294967040 }
 0x139   :  { %230 = vsyncpa [#allocation4], 1 }
 0x13a   :  { %231 = vsyncpa [#allocation7], 1 }
 0x13b   :  { %232 = vsyncpa [#allocation5], 1 }

</bundles_post_ra>
